<compile_context>
chip_gen: v7x
topology: tpu7x:2x2x1
jax: 0.10.0
libtpu: 0.0.40
codegen_flags: <defaults>
</compile_context>

<pallas_src>
import jax
import jax.numpy as jnp
from jax import lax
from jax.experimental import pallas as pl
from jax.experimental.pallas import tpu as pltpu

_LANE = 128
_CHUNK = 256          # inner-loop lanes; (64,256) f32 = 16 vregs per live intermediate
_MAX_TILE_N = 16384   # lanes per grid step (sweep 8192-32768 for very large N)


def _round_up(a, b):
    return -(-a // b) * b


def growthnet_kernel(xT_ref, w1_ref, b1_ref, w2_ref, b2_ref, w3_ref, b3_ref, o_ref):
    w1 = w1_ref[...]                       # (64, 3)
    b1 = b1_ref[...]                       # (64, 1)
    w2 = w2_ref[...]                       # (64, 64)
    b2 = b2_ref[...]                       # (64, 1)
    w3 = w3_ref[...]                       # (1, 64)
    b3 = b3_ref[...]                       # (1, 1)

    tn = xT_ref.shape[1]                   # static
    chunk = min(_CHUNK, tn)
    n_chunks = tn // chunk                 # wrapper guarantees chunk | tn

    def body(c, carry):
        off = pl.multiple_of(c * chunk, chunk)
        xT = xT_ref[:, pl.ds(off, chunk)]            # (3, chunk), batch on lanes

        # Layer 1 (in_features=3): three broadcast FMAs on the VPU.
        # (Optional rebalance if VALU-bound: jnp.dot(w1, xT) to use the idle MXU.)
        h = (w1[:, 0:1] * xT[0:1, :]
             + w1[:, 1:2] * xT[1:2, :]
             + w1[:, 2:3] * xT[2:3, :]
             + b1)                                   # (64, chunk)
        h = jnp.maximum(h, 0.01 * h)                 # leaky_relu: mul + max

        # Layer 2 (64 x 64): MXU matmul, f32 accumulation.
        h = jnp.dot(w2, h, preferred_element_type=jnp.float32) + b2
        h = jnp.maximum(h, 0.01 * h)

        # Layer 3 (64 -> 1): (1,64)@(64,chunk) keeps the result lane-dense.
        o = jnp.dot(w3, h, preferred_element_type=jnp.float32) + b3
        o_ref[:, pl.ds(off, chunk)] = o.astype(o_ref.dtype)
        return carry

    lax.fori_loop(0, n_chunks, body, 0, unroll=min(4, n_chunks))


@jax.jit
def growthnet_forward(x, params):
    """x: (N, 3) float32. params: PyTorch-convention weights (out,in), biases (out,)."""
    n = x.shape[0]

    n_lane = _round_up(n, _LANE)
    tn = min(_MAX_TILE_N, n_lane)
    # Mid-size batch that fits one tile: split into 2 grid steps so v7x's two
    # TensorCores both get work (dimension_semantics only helps with >=2 steps).
    if n_lane == tn and n_lane >= 4 * _CHUNK:
        tn = _round_up(n_lane // 2, _LANE)
    # Inner chunk must divide the tile.
    if tn > _CHUNK:
        tn = _round_up(tn, _CHUNK)
    n_pad = _round_up(n, tn)
    grid = (n_pad // tn,)

    # TODO(synk): if the producer can emit x already in (3, N) layout, drop this
    # pad+transpose — it is an extra full HBM pass over the input.
    xT = jnp.pad(x.T, ((0, 0), (0, n_pad - n)))      # (3, n_pad), lane-dense batch

    w1 = params["w1"]                                # (64, 3)
    w2 = params["w2"]                                # (64, 64)
    w3 = params["w3"]                                # (1, 64)
    b1 = params["b1"].reshape(64, 1)
    b2 = params["b2"].reshape(64, 1)
    b3 = params["b3"].reshape(1, 1)

    const = lambda i: (0, 0)                         # weights/biases stay resident
    out = pl.pallas_call(
        growthnet_kernel,
        out_shape=jax.ShapeDtypeStruct((1, n_pad), jnp.float32),
        grid=grid,
        in_specs=[
            pl.BlockSpec((3, tn), lambda i: (0, i)),  # x^T tile, pipelined
            pl.BlockSpec((64, 3), const),
            pl.BlockSpec((64, 1), const),
            pl.BlockSpec((64, 64), const),
            pl.BlockSpec((64, 1), const),
            pl.BlockSpec((1, 64), const),
            pl.BlockSpec((1, 1), const),
        ],
        out_specs=pl.BlockSpec((1, tn), lambda i: (0, i)),
        compiler_params=pltpu.CompilerParams(
            dimension_semantics=("parallel",)),       # v7x dual-TC sharding
    )(xT, w1, b1, w2, b2, w3, b3)

    return out[:, :n].T                               # (N, 1), original layout


def init_params(key):
    """Deterministic init mimicking PyTorch Linear default (uniform +-1/sqrt(fan_in))."""
    def linear(key, fan_in, fan_out):
        kw, kb = jax.random.split(key)
        bound = 1.0 / (fan_in ** 0.5)
        w = jax.random.uniform(kw, (fan_out, fan_in), jnp.float32, -bound, bound)
        b = jax.random.uniform(kb, (fan_out,), jnp.float32, -bound, bound)
        return w, b

    k1, k2, k3 = jax.random.split(key, 3)
    w1, b1 = linear(k1, 3, 64)
    w2, b2 = linear(k2, 64, 64)
    w3, b3 = linear(k3, 64, 1)
    return {"w1": w1, "b1": b1, "w2": w2, "b2": b2, "w3": w3, "b3": b3}


def reference_forward(x, p):
    h = x @ p["w1"].T + p["b1"]
    h = jnp.where(h >= 0, h, 0.01 * h)
    h = h @ p["w2"].T + p["b2"]
    h = jnp.where(h >= 0, h, 0.01 * h)
    return h @ p["w3"].T + p["b3"]


if __name__ == "__main__":
    key = jax.random.PRNGKey(0)
    kx, kp = jax.random.split(key)
    x = jax.random.normal(kx, (8, 3), jnp.float32)
    params = init_params(kp)

    out = growthnet_forward(x, params)
    out = jax.block_until_ready(out)

    ref = reference_forward(x, params)
    assert out.shape == (8, 1)
    assert jnp.allclose(out, ref, atol=1e-5, rtol=1e-5)
    print("KERNEL_OK")
</pallas_src>

<mosaic_0001>
module attributes {stable_mosaic.version = 11 : i64} {
  func.func @growthnet_kernel(%arg0: i32, %arg1: memref<3x128xf32, #tpu.memory_space<vmem>>, %arg2: memref<64x3xf32, #tpu.memory_space<vmem>>, %arg3: memref<64x1xf32, #tpu.memory_space<vmem>>, %arg4: memref<64x64xf32, #tpu.memory_space<vmem>>, %arg5: memref<64x1xf32, #tpu.memory_space<vmem>>, %arg6: memref<1x64xf32, #tpu.memory_space<vmem>>, %arg7: memref<1x1xf32, #tpu.memory_space<vmem>>, %arg8: memref<1x128xf32, #tpu.memory_space<vmem>>) attributes {dimension_semantics = [#tpu.dimension_semantics<parallel>], iteration_bounds = array<i64: 1>, scalar_prefetch = 0 : i64, scratch_operands = 0 : i64, tpu.core_type = #tpu.core_type<tc>, window_params = [{transform_indices = @transform_0, window_bounds = array<i64: 3, 128>}, {pipeline_mode = #tpu.pipeline_mode<synchronous>, transform_indices = @transform_1, window_bounds = array<i64: 64, 3>}, {pipeline_mode = #tpu.pipeline_mode<synchronous>, transform_indices = @transform_2, window_bounds = array<i64: 64, 1>}, {pipeline_mode = #tpu.pipeline_mode<synchronous>, transform_indices = @transform_3, window_bounds = array<i64: 64, 64>}, {pipeline_mode = #tpu.pipeline_mode<synchronous>, transform_indices = @transform_4, window_bounds = array<i64: 64, 1>}, {pipeline_mode = #tpu.pipeline_mode<synchronous>, transform_indices = @transform_5, window_bounds = array<i64: 1, 64>}, {pipeline_mode = #tpu.pipeline_mode<synchronous>, transform_indices = @transform_6, window_bounds = array<i64: 1, 1>}, {transform_indices = @transform_7, window_bounds = array<i64: 1, 128>}]} {
    %c0 = arith.constant 0 : index
    %c0_0 = arith.constant 0 : index
    %0 = vector.load %arg2[%c0, %c0_0] : memref<64x3xf32, #tpu.memory_space<vmem>>, vector<64x3xf32>
    %c0_1 = arith.constant 0 : index
    %c0_2 = arith.constant 0 : index
    %1 = vector.load %arg3[%c0_1, %c0_2] : memref<64x1xf32, #tpu.memory_space<vmem>>, vector<64x1xf32>
    %c0_3 = arith.constant 0 : index
    %c0_4 = arith.constant 0 : index
    %2 = vector.load %arg4[%c0_3, %c0_4] : memref<64x64xf32, #tpu.memory_space<vmem>>, vector<64x64xf32>
    %c0_5 = arith.constant 0 : index
    %c0_6 = arith.constant 0 : index
    %3 = vector.load %arg5[%c0_5, %c0_6] : memref<64x1xf32, #tpu.memory_space<vmem>>, vector<64x1xf32>
    %c0_7 = arith.constant 0 : index
    %c0_8 = arith.constant 0 : index
    %4 = vector.load %arg6[%c0_7, %c0_8] : memref<1x64xf32, #tpu.memory_space<vmem>>, vector<1x64xf32>
    %c0_9 = arith.constant 0 : index
    %c0_10 = arith.constant 0 : index
    %5 = vector.load %arg7[%c0_9, %c0_10] : memref<1x1xf32, #tpu.memory_space<vmem>>, vector<1x1xf32>
    %c0_i32 = arith.constant 0 : i32
    %c128_i32 = arith.constant 128 : i32
    %6 = arith.muli %c0_i32, %c128_i32 : i32
    %7 = tpu.assume_multiple %6, 128 : i32
    %c0_11 = arith.constant 0 : index
    %8 = arith.index_cast %7 : i32 to index
    %9 = vector.load %arg1[%c0_11, %8] : memref<3x128xf32, #tpu.memory_space<vmem>>, vector<3x128xf32>
    %10 = vector.extract_strided_slice %0 {offsets = [0, 0], sizes = [64, 1], strides = [1, 1]} : vector<64x3xf32> to vector<64x1xf32>
    %11 = vector.extract_strided_slice %9 {offsets = [0, 0], sizes = [1, 128], strides = [1, 1]} : vector<3x128xf32> to vector<1x128xf32>
    %12 = vector.broadcast %10 : vector<64x1xf32> to vector<64x128xf32>
    %13 = vector.broadcast %11 : vector<1x128xf32> to vector<64x128xf32>
    %14 = arith.mulf %12, %13 : vector<64x128xf32>
    %15 = vector.extract_strided_slice %0 {offsets = [0, 1], sizes = [64, 1], strides = [1, 1]} : vector<64x3xf32> to vector<64x1xf32>
    %16 = vector.extract_strided_slice %9 {offsets = [1, 0], sizes = [1, 128], strides = [1, 1]} : vector<3x128xf32> to vector<1x128xf32>
    %17 = vector.broadcast %15 : vector<64x1xf32> to vector<64x128xf32>
    %18 = vector.broadcast %16 : vector<1x128xf32> to vector<64x128xf32>
    %19 = arith.mulf %17, %18 : vector<64x128xf32>
    %20 = arith.addf %14, %19 : vector<64x128xf32>
    %21 = vector.extract_strided_slice %0 {offsets = [0, 2], sizes = [64, 1], strides = [1, 1]} : vector<64x3xf32> to vector<64x1xf32>
    %22 = vector.extract_strided_slice %9 {offsets = [2, 0], sizes = [1, 128], strides = [1, 1]} : vector<3x128xf32> to vector<1x128xf32>
    %23 = vector.broadcast %21 : vector<64x1xf32> to vector<64x128xf32>
    %24 = vector.broadcast %22 : vector<1x128xf32> to vector<64x128xf32>
    %25 = arith.mulf %23, %24 : vector<64x128xf32>
    %26 = arith.addf %20, %25 : vector<64x128xf32>
    %27 = vector.broadcast %1 : vector<64x1xf32> to vector<64x128xf32>
    %28 = arith.addf %26, %27 : vector<64x128xf32>
    %cst = arith.constant 0.00999999977 : f32
    %29 = vector.broadcast %cst : f32 to vector<64x128xf32>
    %30 = arith.mulf %29, %28 : vector<64x128xf32>
    %31 = arith.maximumf %28, %30 : vector<64x128xf32>
    %cst_12 = arith.constant dense<0.000000e+00> : vector<64x128xf32>
    %32 = tpu.matmul %2, %31, %cst_12 {dimension_numbers = #tpu.dot_dimension_numbers<[1], [0], [0], [1], [0, 0, 1, 1], [], []>} : vector<64x64xf32>, vector<64x128xf32>, vector<64x128xf32> -> vector<64x128xf32>
    %33 = vector.broadcast %3 : vector<64x1xf32> to vector<64x128xf32>
    %34 = arith.addf %32, %33 : vector<64x128xf32>
    %cst_13 = arith.constant 0.00999999977 : f32
    %35 = vector.broadcast %cst_13 : f32 to vector<64x128xf32>
    %36 = arith.mulf %35, %34 : vector<64x128xf32>
    %37 = arith.maximumf %34, %36 : vector<64x128xf32>
    %cst_14 = arith.constant dense<0.000000e+00> : vector<1x128xf32>
    %38 = tpu.matmul %4, %37, %cst_14 {dimension_numbers = #tpu.dot_dimension_numbers<[1], [0], [0], [1], [0, 0, 1, 1], [], []>} : vector<1x64xf32>, vector<64x128xf32>, vector<1x128xf32> -> vector<1x128xf32>
    %39 = vector.broadcast %5 : vector<1x1xf32> to vector<1x128xf32>
    %40 = arith.addf %38, %39 : vector<1x128xf32>
    %c0_15 = arith.constant 0 : index
    %41 = arith.index_cast %7 : i32 to index
    %42 = vector.load %arg8[%c0_15, %41] : memref<1x128xf32, #tpu.memory_space<vmem>>, vector<1x128xf32>
    tpu.vector_store %arg8[%c0_15, %41], %40 {strides = array<i32>} : memref<1x128xf32, #tpu.memory_space<vmem>>, vector<1x128xf32>,
    %c1_i32 = arith.constant 1 : i32
    return
  }
  func.func @transform_0(%arg0: i32) -> (i32, i32) {
    %c0_i32 = arith.constant 0 : i32
    %c0_i32_0 = arith.constant 0 : i32
    return %c0_i32, %arg0 : i32, i32
  }
  func.func @transform_1(%arg0: i32) -> (i32, i32) {
    %c0_i32 = arith.constant 0 : i32
    %c0_i32_0 = arith.constant 0 : i32
    %c0_i32_1 = arith.constant 0 : i32
    return %c0_i32, %c0_i32_0 : i32, i32
  }
  func.func @transform_2(%arg0: i32) -> (i32, i32) {
    %c0_i32 = arith.constant 0 : i32
    %c0_i32_0 = arith.constant 0 : i32
    %c0_i32_1 = arith.constant 0 : i32
    return %c0_i32, %c0_i32_0 : i32, i32
  }
  func.func @transform_3(%arg0: i32) -> (i32, i32) {
    %c0_i32 = arith.constant 0 : i32
    %c0_i32_0 = arith.constant 0 : i32
    %c0_i32_1 = arith.constant 0 : i32
    return %c0_i32, %c0_i32_0 : i32, i32
  }
  func.func @transform_4(%arg0: i32) -> (i32, i32) {
    %c0_i32 = arith.constant 0 : i32
    %c0_i32_0 = arith.constant 0 : i32
    %c0_i32_1 = arith.constant 0 : i32
    return %c0_i32, %c0_i32_0 : i32, i32
  }
  func.func @transform_5(%arg0: i32) -> (i32, i32) {
    %c0_i32 = arith.constant 0 : i32
    %c0_i32_0 = arith.constant 0 : i32
    %c0_i32_1 = arith.constant 0 : i32
    return %c0_i32, %c0_i32_0 : i32, i32
  }
  func.func @transform_6(%arg0: i32) -> (i32, i32) {
    %c0_i32 = arith.constant 0 : i32
    %c0_i32_0 = arith.constant 0 : i32
    %c0_i32_1 = arith.constant 0 : i32
    return %c0_i32, %c0_i32_0 : i32, i32
  }
  func.func @transform_7(%arg0: i32) -> (i32, i32) {
    %c0_i32 = arith.constant 0 : i32
    %c0_i32_0 = arith.constant 0 : i32
    return %c0_i32, %arg0 : i32, i32
  }
}

</mosaic_0001>

<bundles_post_ra>
// kernel: growthnet_forward.1
= control target key start
LH: loop header
LB: loop body
LE: loop exit
PB: predicated region body
PF: predicated region fallthrough
CT: control target
= control target key end

     0   :  { %v686_v0 = vmov 2   ;;  %v687_v1 = vmov 1   ;;  %v688_v8 = vmov 0   ;;  %vm323_vm0 = vcmask 523264   ;;  %s907_s1 = inlined_call_operand.vmem [shape: f32[64,3], index: 1, kind: input, shape index: {}]   ;;  %s908_s6 = inlined_call_operand.<no memory space> [shape: f32[1,1], index: 6, kind: input, shape index: {}]   ;;  %s909_s2 = inlined_call_operand.vmem [shape: f32[64,1], index: 2, kind: input, shape index: {}]   ;;  %s910_s4 = inlined_call_operand.vmem [shape: f32[64,1], index: 4, kind: input, shape index: {}]   ;;  %s911_s3 = inlined_call_operand.vmem [shape: f32[64,64], index: 3, kind: input, shape index: {}]   ;;  %s912_s0 = inlined_call_operand.vmem [shape: f32[3,128], index: 0, kind: input, shape index: {}]   ;;  %s913_s5 = inlined_call_operand.vmem [shape: f32[1,64], index: 5, kind: input, shape index: {}]   ;;  %s914_s7 = inlined_call_operand.vmem [shape: f32[1,128], index: 7, kind: output, shape index: {}]  }
   0x1   :  { %672 = vset.pattern.permute.xlu0 %v686_v0  ;;  %671 = vset.pattern.permute.xlu1 %v687_v1  ;;  %v28_v2 = vld [vmem:[%s907_s1] sm:$0xff]  ;;  %v12_v3 = vstv %s908_s6  ;;  %v30_v4 = vld [vmem:[%s907_s1 + $0x10] sm:$0xff]  ;;  %v29_v5 = vld [vmem:[%s907_s1 + $0x8] sm:$0xff]  ;;  %v103_v36 = vlaneseq  ;;  %vm690_vm1 = vmmov 0  }
   0x2   :  { %168 = vperm.xlu0 %672, %v28_v2   ;;  %116 = vperm.xlu1 %671, %v28_v2   ;;  %13 = vst [vmem:[#allocation2] sm:$0x1] %v12_v3  ;;  %v33_v6 = vld [vmem:[%s907_s1 + $0x28] sm:$0xff]  ;;  %v32_v7 = vld [vmem:[%s907_s1 + $0x20] sm:$0xff]  ;;  %v35_v9 = vld [vmem:[%s907_s1 + $0x38] sm:$0xff] }
   0x3   :  { %v31_v10 = vld [vmem:[%s907_s1 + $0x18] sm:$0xff]  ;;  %v36_v11 = vld [vmem:[%s909_s2] sm:$0xff]  ;;  %v37_v12 = vld [vmem:[%s909_s2 + $0x8] sm:$0xff]  ;;  %v825_v38 = vshrl.u32 %v103_v36, 7 }
   0x4   :  { %v34_v13 = vld [vmem:[%s907_s1 + $0x30] sm:$0xff]  ;;  %v40_v14 = vld [vmem:[%s909_s2 + $0x20] sm:$0xff]  ;;  %v43_v15 = vld [vmem:[%s909_s2 + $0x38] sm:$0xff] }
   0x5   :  { %v53_v16 = vld [vmem:[%s910_s4 + $0x8] sm:$0xff]  ;;  %v55_v17 = vld [vmem:[%s910_s4 + $0x18] sm:$0xff]  ;;  %v38_v18 = vld [vmem:[%s909_s2 + $0x10] sm:$0xff]  ;;  %v149_v41 = vsub.s32 1, %v825_v38  ;;  %v105_v42 = vsub.s32 0, %v825_v38  ;;  %v201_v46 = vsub.s32 2, %v825_v38 }
   0x6   :  { %176 = vperm.xlu0 %672, %v30_v4   ;;  %120 = vperm.xlu1 %671, %v29_v5   ;;  %v57_v19 = vld [vmem:[%s910_s4 + $0x28] sm:$0xff]  ;;  %v39_v20 = vld [vmem:[%s909_s2 + $0x18] sm:$0xff]  ;;  %v42_v23 = vld [vmem:[%s909_s2 + $0x30] sm:$0xff] }
   0x7   :  { %v59_v21 = vld [vmem:[%s910_s4 + $0x38] sm:$0xff]  ;;  %v41_v22 = vld [vmem:[%s909_s2 + $0x28] sm:$0xff]  ;;  %v52_v24 = vld [vmem:[%s910_s4] sm:$0xff] }
   0x8   :  { %v54_v25 = vld [vmem:[%s910_s4 + $0x10] sm:$0xff]  ;;  %v56_v26 = vld [vmem:[%s910_s4 + $0x20] sm:$0xff] }
   0x9   :  { %v44_v27 = vld [vmem:[%s911_s3] sm:$0xff]  ;;  %v58_v28 = vld [vmem:[%s910_s4 + $0x30] sm:$0xff] }
   0xa   :  { %188 = vperm.xlu0 %672, %v33_v6   ;;  %673 = vset.pattern.permute.xlu1 %v686_v0  ;;  %v61_v29 = vld [vmem:[#allocation2] sm:$0x1] }
   0xb   :  { %172 = vperm.xlu1 %673, %v29_v5   ;;  %606 = vmatprep.mubr.msk.f32.mxu0 %vm323_vm0, %v44_v27  ;;  %v62_v43 = vld [vmem:[%s912_s0] sm:$0x7] }
   0xc   :  { %v834_v45 = vrot.slane %v62_v43, %v149_v41  ;;  %v839_v47 = vrot.slane %v62_v43, %v105_v42  ;;  %v843_v52 = vrot.slane %v62_v43, %v201_v46 }
   0xe   :  { %680 = vset.pattern.permute.xlu0 %v687_v1 }
   0xf   :  { %132 = vperm.xlu0 %680, %v32_v7   ;;  %674 = vset.pattern.permute.xlu1 %v688_v8 }
  0x10   :  { %75 = vperm.xlu1 %674, %v30_v4  }
  0x13   :  { %144 = vperm.xlu0 %680, %v35_v9  }
  0x14   :  { %675 = vset.pattern.permute.xlu1 %v687_v1 }
  0x15   :  { %124 = vperm.xlu1 %675, %v30_v4  }
  0x17   :  { %683 = vset.pattern.permute.xlu0 %v688_v8 }
  0x18   :  { %65 = vperm.xlu0 %683, %v28_v2  }
  0x19   :  { %128 = vperm.xlu1 %675, %v31_v10  }
  0x1c   :  { %70 = vperm.xlu0 %683, %v29_v5  }
  0x1d   :  { %676 = vset.pattern.permute.xlu1 %v686_v0 }
  0x1e   :  { %180 = vperm.xlu1 %676, %v31_v10  }
  0x20   :  { %80 = vperm.xlu0 %683, %v31_v10  }
  0x22   :  { %677 = vset.pattern.permute.xlu1 %v688_v8 }
  0x23   :  { %221 = vperm.xlu1 %677, %v36_v11  }
  0x24   :  { %226 = vperm.xlu0 %683, %v37_v12  }
  0x27   :  { %85 = vperm.xlu1 %677, %v32_v7  }
  0x28   :  { %95 = vperm.xlu0 %683, %v34_v13  }
  0x2b   :  { %90 = vperm.xlu1 %677, %v33_v6  }
  0x2c   :  { %241 = vperm.xlu0 %683, %v40_v14  }
  0x2f   :  { %678 = vset.pattern.permute.xlu1 %v687_v1 }
  0x30   :  { %136 = vperm.xlu1 %678, %v33_v6   ;;  %256 = vperm.xlu0 %683, %v43_v15  }
  0x34   :  { %679 = vset.pattern.permute.xlu1 %v686_v0  ;;  %290 = vperm.xlu0 %683, %v53_v16  }
  0x35   :  { %184 = vperm.xlu1 %679, %v32_v7  }
  0x38   :  { %300 = vperm.xlu0 %683, %v55_v17  }
  0x39   :  { %681 = vset.pattern.permute.xlu1 %v688_v8 }
  0x3a   :  { %231 = vperm.xlu1 %681, %v38_v18  }
  0x3c   :  { %310 = vperm.xlu0 %683, %v57_v19  }
  0x3e   :  { %236 = vperm.xlu1 %681, %v39_v20  }
  0x40   :  { %320 = vperm.xlu0 %683, %v59_v21  }
  0x42   :  { %100 = vperm.xlu1 %681, %v35_v9  }
  0x46   :  { %682 = vset.pattern.permute.xlu1 %v687_v1 }
  0x47   :  { %140 = vperm.xlu1 %682, %v34_v13  }
  0x4b   :  { %684 = vset.pattern.permute.xlu1 %v686_v0 }
  0x4c   :  { %192 = vperm.xlu1 %684, %v34_v13  }
  0x50   :  { %196 = vperm.xlu1 %684, %v35_v9  }
  0x54   :  { %685 = vset.pattern.permute.xlu1 %v688_v8 }
  0x55   :  { %246 = vperm.xlu1 %685, %v41_v22  }
  0x59   :  { %251 = vperm.xlu1 %685, %v42_v23  }
  0x5d   :  { %285 = vperm.xlu1 %685, %v52_v24  }
  0x61   :  { %295 = vperm.xlu1 %685, %v54_v25  }
  0x65   :  { %305 = vperm.xlu1 %685, %v56_v26  }
  0x69   :  { %315 = vperm.xlu1 %685, %v58_v28  }
  0x6d   :  { %471 = vperm.xlu1 %685, %v61_v29  }
  0x81   :  { %v117_v30 = vpop.permute.xlu1 %116  ;;  %v169_v31 = vpop.permute.xlu0 %168 }
  0x82   :  { %v151_v51 = vmul.f32 %v834_v45, %v117_v30  ;;  %v203_v56 = vmul.f32 %v843_v52, %v169_v31 }
  0x85   :  { %v121_v32 = vpop.permute.xlu1 %120  ;;  %v177_v33 = vpop.permute.xlu0 %176 }
  0x86   :  { %v152_v54 = vmul.f32 %v834_v45, %v121_v32  ;;  %v205_v14 = vmul.f32 %v843_v52, %v177_v33 }
  0x89   :  { %v821_v34 = vpop.permute.xlu0 %188 }
  0x8a   :  { %v173_v35 = vpop.permute.xlu1 %172 }
  0x8b   :  { %v204_v61 = vmul.f32 %v843_v52, %v173_v35 }
  0x8e   :  { %v823_v37 = vpop.permute.xlu0 %132 }
  0x8f   :  { %v76_v39 = vpop.permute.xlu1 %75  ;;  %v155_v35 = vmul.f32 %v834_v45, %v823_v37 }
  0x90   :  { %v109_v13 = vmul.f32 %v839_v47, %v76_v39 }
  0x92   :  { %v827_v40 = vpop.permute.xlu0 %144 }
  0x94   :  { %v125_v44 = vpop.permute.xlu1 %124 }
  0x95   :  { %v153_v12 = vmul.f32 %v834_v45, %v125_v44 }
  0x97   :  { %v66_v48 = vpop.permute.xlu0 %65  ;;  %v161_v15 = vadd.f32 %v153_v12, %v109_v13  ;;  %v45_v13 = vld [vmem:[%s911_s3 + $0x8] sm:$0xff] }
  0x98   :  { %v129_v49 = vpop.permute.xlu1 %128  ;;  %v107_v50 = vmul.f32 %v839_v47, %v66_v48 }
  0x99   :  { %v154_v18 = vmul.f32 %v834_v45, %v129_v49  ;;  %v213_v20 = vadd.f32 %v205_v14, %v161_v15  ;;  %v46_v14 = vld [vmem:[%s911_s3 + $0x10] sm:$0xff]  ;;  %v47_v15 = vld [vmem:[%s911_s3 + $0x18] sm:$0xff] }
  0x9a   :  { %v159_v57 = vadd.f32 %v151_v51, %v107_v50  ;;  %v158_v51 = vmul.f32 %v834_v45, %v827_v40 }
  0x9b   :  { %v71_v53 = vpop.permute.xlu0 %70 }
  0x9c   :  { %v108_v55 = vmul.f32 %v839_v47, %v71_v53  ;;  %v211_v62 = vadd.f32 %v203_v56, %v159_v57  ;;  %v208_v57 = vmul.f32 %v843_v52, %v821_v34 }
  0x9d   :  { %v181_v58 = vpop.permute.xlu1 %180 }
  0x9e   :  { %v160_v59 = vadd.f32 %v152_v54, %v108_v55  ;;  %v206_v22 = vmul.f32 %v843_v52, %v181_v58 }
  0x9f   :  { %v81_v60 = vpop.permute.xlu0 %80 }
  0xa0   :  { %v212_v0 = vadd.f32 %v204_v61, %v160_v59  ;;  %v110_v16 = vmul.f32 %v839_v47, %v81_v60 }
  0xa2   :  { %v222_v63 = vpop.permute.xlu1 %221  ;;  %v162_v19 = vadd.f32 %v154_v18, %v110_v16  ;;  %v48_v16 = vld [vmem:[%s911_s3 + $0x20] sm:$0xff]  ;;  %v50_v18 = vld [vmem:[%s911_s3 + $0x30] sm:$0xff] }
  0xa3   :  { %v259_v1 = vadd.f32 %v222_v63, %v211_v62  ;;  %v227_v2 = vpop.permute.xlu0 %226 }
  0xa4   :  { %v260_v3 = vadd.f32 %v227_v2, %v212_v0  ;;  %v214_v24 = vadd.f32 %v206_v22, %v162_v19  ;;  %v51_v19 = vld [vmem:[%s911_s3 + $0x38] sm:$0xff] }
  0xa5   :  { %v267_v4 = vmul.f32 0.01, %v259_v1 }
  0xa6   :  { %v268_v5 = vmul.f32 0.01, %v260_v3  ;;  %v86_v6 = vpop.permute.xlu1 %85 }
  0xa7   :  { %v275_v7 = vmax.f32 %v259_v1, %v267_v4  ;;  %v111_v36 = vmul.f32 %v839_v47, %v86_v6  ;;  %v96_v39 = vpop.permute.xlu0 %95 }
  0xa8   :  { %v276_v8 = vmax.f32 %v260_v3, %v268_v5  ;;  %v113_v61 = vmul.f32 %v839_v47, %v96_v39 }
  0xa9   :  { %v163_v43 = vadd.f32 %v155_v35, %v111_v36 }
  0xaa   :  { %v91_v9 = vpop.permute.xlu1 %90  ;;  %v637_v10 = vpack.c.bf16 %v276_v8, %v275_v7 }
  0xab   :  { %v112_v49 = vmul.f32 %v839_v47, %v91_v9  ;;  %v242_v53 = vpop.permute.xlu0 %241 }
  0xac   :  { %638 = vmatprep.subr.bf16.mxu0 %v637_v10 }
  0xad   :  { %640 = vmatpush3.bf16.msra.mxu0 %v637_v10 }
  0xaf   :  { %v137_v11 = vpop.permute.xlu1 %136  ;;  %v257_v0 = vpop.permute.xlu0 %256 }
  0xb0   :  { %v156_v44 = vmul.f32 %v834_v45, %v137_v11 }
  0xb2   :  { %v164_v37 = vadd.f32 %v156_v44, %v112_v49 }
  0xb3   :  { %v291_v22 = vpop.permute.xlu0 %290 }
  0xb4   :  { %v185_v17 = vpop.permute.xlu1 %184  ;;  %v216_v63 = vadd.f32 %v208_v57, %v164_v37 }
  0xb5   :  { %v207_v41 = vmul.f32 %v843_v52, %v185_v17  ;;  %v49_v17 = vld [vmem:[%s911_s3 + $0x28] sm:$0xff] }
  0xb7   :  { %v215_v50 = vadd.f32 %v207_v41, %v163_v43 }
  0xb9   :  { %v232_v21 = vpop.permute.xlu1 %231  ;;  %v263_v58 = vadd.f32 %v242_v53, %v215_v50 }
  0xba   :  { %v261_v23 = vadd.f32 %v232_v21, %v213_v20  ;;  %v689_v20 = vmov 0.0|0.0   ;;  %v691_v21 = vmov 0.0  }
  0xbb   :  { %v271_v1 = vmul.f32 0.01, %v263_v58  ;;  %653 = vmatprep.subr.bf16.mxu1 %v689_v20  ;;  %634 = vmatprep.mubr.msk.f32.mxu1 %vm690_vm1, %v691_v21 }
  0xbc   :  { %v269_v26 = vmul.f32 0.01, %v261_v23 }
  0xbd   :  { %v237_v25 = vpop.permute.xlu1 %236  ;;  %v279_v10 = vmax.f32 %v263_v58, %v271_v1 }
  0xbe   :  { %v262_v27 = vadd.f32 %v237_v25, %v214_v24  ;;  %v277_v30 = vmax.f32 %v261_v23, %v269_v26  ;;  %v301_v24 = vpop.permute.xlu0 %300 }
  0xc0   :  { %v270_v28 = vmul.f32 0.01, %v262_v27 }
  0xc1   :  { %v101_v29 = vpop.permute.xlu1 %100 }
  0xc2   :  { %v278_v31 = vmax.f32 %v262_v27, %v270_v28  ;;  %v114_v48 = vmul.f32 %v839_v47, %v101_v29  ;;  %v311_v39 = vpop.permute.xlu0 %310 }
  0xc4   :  { %v641_v32 = vpack.c.bf16 %v278_v31, %v277_v30  ;;  %v166_v55 = vadd.f32 %v158_v51, %v114_v48 }
  0xc6   :  { %v141_v33 = vpop.permute.xlu1 %140  ;;  %642 = vmatprep.subr.bf16.mxu0 %v641_v32  ;;  %v321_v57 = vpop.permute.xlu0 %320 }
  0xc7   :  { %644 = vmatpush3.bf16.msra.mxu0 %v641_v32  ;;  %v157_v59 = vmul.f32 %v834_v45, %v141_v33 }
  0xc9   :  { %v165_v2 = vadd.f32 %v157_v59, %v113_v61 }
  0xcb   :  { %v193_v46 = vpop.permute.xlu1 %192 }
  0xcc   :  { %v209_v62 = vmul.f32 %v843_v52, %v193_v46 }
  0xce   :  { %v217_v6 = vadd.f32 %v209_v62, %v165_v2 }
  0xcf   :  { %v197_v54 = vpop.permute.xlu1 %196 }
  0xd0   :  { %v210_v56 = vmul.f32 %v843_v52, %v197_v54 }
  0xd2   :  { %v218_v60 = vadd.f32 %v210_v56, %v166_v55 }
  0xd4   :  { %v247_v40 = vpop.permute.xlu1 %246  ;;  %v266_v3 = vadd.f32 %v257_v0, %v218_v60 }
  0xd5   :  { %v264_v4 = vadd.f32 %v247_v40, %v216_v63 }
  0xd6   :  { %v274_v8 = vmul.f32 0.01, %v266_v3 }
  0xd7   :  { %v272_v5 = vmul.f32 0.01, %v264_v4 }
  0xd8   :  { %v252_v7 = vpop.permute.xlu1 %251  ;;  %v282_v47 = vmax.f32 %v266_v3, %v274_v8  ;;  %v60_v8 = vld [vmem:[%s913_s5] sm:$0x1] }
  0xd9   :  { %v280_v34 = vmax.f32 %v264_v4, %v272_v5  ;;  %v265_v9 = vadd.f32 %v252_v7, %v217_v6 }
  0xdb   :  { %v273_v45 = vmul.f32 0.01, %v265_v9  ;;  %v645_v11 = vpack.c.bf16 %v280_v34, %v279_v10 }
  0xdc   :  { %v286_v23 = vpop.permute.xlu1 %285 }
  0xdd   :  { %v281_v12 = vmax.f32 %v265_v9, %v273_v45  ;;  %646 = vmatprep.subr.bf16.mxu0 %v645_v11 }
  0xde   :  { %648 = vmatpush3.bf16.msra.mxu0 %v645_v11 }
  0xdf   :  { %v649_v52 = vpack.c.bf16 %v282_v47, %v281_v12 }
  0xe0   :  { %v296_v26 = vpop.permute.xlu1 %295 }
  0xe1   :  { %650 = vmatprep.subr.bf16.mxu0 %v649_v52 }
  0xe2   :  { %652 = vmatpush3.bf16.msra.mxu0 %v649_v52 }
  0xe4   :  { %v306_v44 = vpop.permute.xlu1 %305 }
  0xe5   :  { %607 = vmatmul.mubr.msk.f32.vlgmr.msra.gmra.mrb[0].mxu0 %vm323_vm0, %v45_v13 }
  0xe6   :  { %609 = vmatprep.mubr.msk.f32.mxu0 %vm323_vm0, %v46_v14 }
  0xe8   :  { %v316_v61 = vpop.permute.xlu1 %315 }
  0xe9   :  { %610 = vmatmul.mubr.msk.f32.gmra.mrb[2].mxu0 %vm323_vm0, %v47_v15 }
  0xea   :  { %612 = vmatprep.mubr.msk.f32.mxu0 %vm323_vm0, %v48_v16 }
  0xec   :  { %v472_v34 = vpop.permute.xlu1 %471 }
  0xed   :  { %613 = vmatmul.mubr.msk.f32.gmra.mrb[4].mxu0 %vm323_vm0, %v49_v17  ;;  %v477_v9 = vrot.slane %v472_v34, %v105_v42 }
  0xee   :  { %615 = vmatprep.mubr.msk.f32.mxu0 %vm323_vm0, %v50_v18 }
  0xf1   :  { %616 = vmatmul.mubr.msk.f32.gmra.mrb[6].mxu0 %vm323_vm0, %v51_v19 }
 0x1b8   :  { %v608_v25 = vpop.f32.mrb[0].mxu0 }
 0x1b9   :  { %v420_v27 = vadd.f32 %v608_v25, %v291_v22  ;;  %v414_v28 = vpop.f32.mrb[1].mxu0 }
 0x1ba   :  { %v415_v29 = vadd.f32 %v414_v28, %v286_v23 }
 0x1bb   :  { %v454_v30 = vmul.f32 0.01, %v420_v27 }
 0x1bc   :  { %v453_v31 = vmul.f32 0.01, %v415_v29  ;;  %v611_v32 = vpop.f32.mrb[2].mxu0 }
 0x1bd   :  { %v462_v33 = vmax.f32 %v420_v27, %v454_v30  ;;  %v430_v35 = vadd.f32 %v611_v32, %v301_v24  ;;  %v424_v36 = vpop.f32.mrb[3].mxu0 }
 0x1be   :  { %v461_v41 = vmax.f32 %v415_v29, %v453_v31  ;;  %v425_v43 = vadd.f32 %v424_v36, %v296_v26 }
 0x1bf   :  { %v456_v46 = vmul.f32 0.01, %v430_v35 }
 0x1c0   :  { %v455_v48 = vmul.f32 0.01, %v425_v43  ;;  %v614_v49 = vpop.f32.mrb[4].mxu0  ;;  %v654_v50 = vpack.c.bf16 %v462_v33, %v461_v41 }
 0x1c1   :  { %v464_v51 = vmax.f32 %v430_v35, %v456_v46  ;;  %v440_v53 = vadd.f32 %v614_v49, %v311_v39  ;;  %v434_v37 = vpop.f32.mrb[5].mxu0 }
 0x1c2   :  { %v463_v54 = vmax.f32 %v425_v43, %v455_v48  ;;  %v435_v55 = vadd.f32 %v434_v37, %v306_v44  ;;  %655 = vmatpush3.bf16.msra.mxu1 %v654_v50 }
 0x1c3   :  { %v458_v56 = vmul.f32 0.01, %v440_v53  ;;  %656 = vmatprep.subr.bf16.mxu1 %v689_v20 }
 0x1c4   :  { %v457_v58 = vmul.f32 0.01, %v435_v55  ;;  %v617_v59 = vpop.f32.mrb[6].mxu0  ;;  %v657_v60 = vpack.c.bf16 %v464_v51, %v463_v54 }
 0x1c5   :  { %v466_v62 = vmax.f32 %v440_v53, %v458_v56  ;;  %v450_v63 = vadd.f32 %v617_v59, %v321_v57  ;;  %v444_v0 = vpop.f32.mrb[7].mxu0 }
 0x1c6   :  { %v465_v40 = vmax.f32 %v435_v55, %v457_v58  ;;  %v445_v1 = vadd.f32 %v444_v0, %v316_v61  ;;  %658 = vmatpush3.bf16.msra.mxu1 %v657_v60 }
 0x1c7   :  { %v460_v2 = vmul.f32 0.01, %v450_v63  ;;  %659 = vmatprep.subr.bf16.mxu1 %v689_v20 }
 0x1c8   :  { %v459_v3 = vmul.f32 0.01, %v445_v1  ;;  %v660_v4 = vpack.c.bf16 %v466_v62, %v465_v40 }
 0x1c9   :  { %v468_v5 = vmax.f32 %v450_v63, %v460_v2 }
 0x1ca   :  { %v467_v6 = vmax.f32 %v445_v1, %v459_v3  ;;  %661 = vmatpush3.bf16.msra.mxu1 %v660_v4 }
 0x1cb   :  { %662 = vmatprep.subr.bf16.mxu1 %v689_v20 }
 0x1cc   :  { %v663_v7 = vpack.c.bf16 %v468_v5, %v467_v6 }
 0x1ce   :  { %664 = vmatpush3.bf16.msra.mxu1 %v663_v7 }
 0x1d1   :  { %635 = vmatmul.mubr.msk.f32.vlgmr.msra.gmra.mrb[0].mxu1 %vm323_vm0, %v60_v8 }
 0x2a4   :  { %v547_v10 = vpop.f32.mrb[0].mxu1 }
 0x2a5   :  { %v548_v45 = vadd.f32 %v547_v10, %v477_v9  ;;  %v636_v11 = vpop.f32.mrb[1].mxu1 }
 0x2a7   :  { %551 = vst [vmem:[%s914_s7] sm:$0x1] %v548_v45 }

</bundles_post_ra>
